<compile_context>
chip_gen: v7x
topology: tpu7x:2x2x1
jax: 0.10.0
libtpu: 0.0.40
codegen_flags: <defaults>
</compile_context>

<pallas_src>
import jax
import jax.numpy as jnp
from jax.experimental import pallas as pl
from jax.experimental.pallas import tpu as pltpu


def _mlp_kernel(x_ref, w1_ref, b1_ref, w2_ref, b2_ref, o_ref):
    # Two tiny matmuls + bias + ReLU, fully fused.  MXU is massively
    # underutilized (hidden=3) but the kernel is HBM-bound, so compute is free.
    x = x_ref[...]                                                    # (TB, F_in)
    h = jnp.dot(x, w1_ref[...], preferred_element_type=jnp.float32)  # (TB, H) f32
    h = jnp.maximum(h + b1_ref[...], 0.0)                            # f32 bias + ReLU
    if w2_ref.dtype != jnp.float32:
        # NOTE: deliberate downcast of the f32 layer-1 accumulator when running
        # bf16 (wider error than pure "bf16 in, f32 acc"); documented in wrapper.
        h = h.astype(w2_ref.dtype)
    o = jnp.dot(h, w2_ref[...], preferred_element_type=jnp.float32)  # (TB, F_out)
    o = o + b2_ref[...]                                              # f32 bias
    o_ref[...] = o.astype(o_ref.dtype)


def _round_up(n, m):
    return ((n + m - 1) // m) * m


def mlp_pallas(x, w1, b1, w2, b2, *, block_b=None, compute_dtype=None,
               vmem_limit_bytes=48 * 1024 * 1024):
    """x: (B, F_in); w1: (F_in, H); b1: (H,); w2: (H, F_out); b2: (F_out,).

    compute_dtype: optionally jnp.bfloat16 to halve HBM traffic on x/w1/w2
    (biases stay f32; MXU accumulation stays f32 via preferred_element_type,
    but the layer-1 activation is downcast to bf16 before the second matmul,
    so use a loose tolerance).  Output dtype follows the *original* x dtype.
    """
    B, F_in = x.shape
    H = w1.shape[1]
    F_out = w2.shape[1]
    out_dtype = x.dtype  # captured BEFORE the optional compute_dtype cast

    # bf16 packs 16 sublanes per vreg; f32 packs 8.
    sublane = 16 if compute_dtype == jnp.bfloat16 else 8

    if block_b is None:
        # Big tile to amortize ~0.35us/step overhead and approach the HBM
        # roofline, but capped so that the lane-padded (block_b, 128) x tile
        # and out tile (double-buffered) stay well inside v7x's 64 MiB VMEM,
        # and split into >=4 pieces for large B so v7x's 2 TensorCores both
        # get work via dimension_semantics=("parallel",).
        cap = 8192
        block_b = min(cap, _round_up(pl.cdiv(max(B, 1), 4), sublane))
    block_b = max(sublane, (block_b // sublane) * sublane)

    # --- optional bf16 inputs/weights (mem-bound kernel: halves x/w bytes) ---
    if compute_dtype is not None:
        x = x.astype(compute_dtype)
        w1 = w1.astype(compute_dtype)
        w2 = w2.astype(compute_dtype)

    b1_2d = b1.astype(jnp.float32).reshape(1, H)
    b2_2d = b2.astype(jnp.float32).reshape(1, F_out)

    # Ragged final block: Pallas masks the edge block, no padding of x needed.
    grid = (pl.cdiv(B, block_b),)

    # Constant-index operands: single-buffer them so VMEM goes to the batch tile.
    const_buf = pl.Buffered(1)

    out = pl.pallas_call(
        _mlp_kernel,
        out_shape=jax.ShapeDtypeStruct((B, F_out), out_dtype),
        grid_spec=pltpu.PrefetchScalarGridSpec(
            num_scalar_prefetch=0,
            grid=grid,
            in_specs=[
                pl.BlockSpec((block_b, F_in), lambda i: (i, 0)),        # x tile
                pl.BlockSpec((F_in, H), lambda i: (0, 0),
                             pipeline_mode=const_buf),                  # w1 (full)
                pl.BlockSpec((1, H), lambda i: (0, 0),
                             pipeline_mode=const_buf),                  # b1
                pl.BlockSpec((H, F_out), lambda i: (0, 0),
                             pipeline_mode=const_buf),                  # w2 (full)
                pl.BlockSpec((1, F_out), lambda i: (0, 0),
                             pipeline_mode=const_buf),                  # b2
            ],
            out_specs=pl.BlockSpec((block_b, F_out), lambda i: (i, 0)),
        ),
        compiler_params=pltpu.CompilerParams(
            dimension_semantics=("parallel",),
            vmem_limit_bytes=vmem_limit_bytes),
    )(x, w1, b1_2d, w2, b2_2d)

    return out


def init_params(key, num_input_features, num_output_features, hidden=3,
                dtype=jnp.float32):
    """Deterministic init mimicking PyTorch Linear default (uniform +/- 1/sqrt(fan_in))."""
    k1, k2, k3, k4 = jax.random.split(key, 4)
    bound1 = 1.0 / jnp.sqrt(num_input_features)
    bound2 = 1.0 / jnp.sqrt(hidden)
    w1 = jax.random.uniform(k1, (num_input_features, hidden), dtype,
                            minval=-bound1, maxval=bound1)
    b1 = jax.random.uniform(k2, (hidden,), dtype, minval=-bound1, maxval=bound1)
    w2 = jax.random.uniform(k3, (hidden, num_output_features), dtype,
                            minval=-bound2, maxval=bound2)
    b2 = jax.random.uniform(k4, (num_output_features,), dtype,
                            minval=-bound2, maxval=bound2)
    return w1, b1, w2, b2


def mlp_ref(x, w1, b1, w2, b2):
    h = jnp.maximum(x @ w1 + b1, 0.0)
    return h @ w2 + b2


if __name__ == "__main__":
    key = jax.random.PRNGKey(0)
    kx, kp, kx2 = jax.random.split(key, 3)

    num_input_features = 32
    num_output_features = 4
    w1, b1, w2, b2 = init_params(kp, num_input_features, num_output_features)

    # --- small shape consistent with the module (single grid step) ---
    batch = 8
    x = jax.random.normal(kx, (batch, num_input_features), jnp.float32)
    out = jax.block_until_ready(mlp_pallas(x, w1, b1, w2, b2))
    ref = mlp_ref(x, w1, b1, w2, b2)
    assert out.shape == (batch, num_output_features)
    assert out.dtype == x.dtype
    assert jnp.allclose(out, ref, atol=1e-5, rtol=1e-5), "mismatch vs reference (small)"

    # --- larger / ragged batch: exercises cdiv grid + masked edge block ---
    batch2 = 1000  # block_b=256 -> grid of 4, last block ragged (232 rows)
    x2 = jax.random.normal(kx2, (batch2, num_input_features), jnp.float32)
    out2 = jax.block_until_ready(mlp_pallas(x2, w1, b1, w2, b2))
    ref2 = mlp_ref(x2, w1, b1, w2, b2)
    assert out2.shape == (batch2, num_output_features)
    assert jnp.allclose(out2, ref2, atol=1e-5, rtol=1e-5), "mismatch vs reference (tiled)"

    # --- user-supplied block_b that does not divide B (ragged edge) ---
    out2b = jax.block_until_ready(mlp_pallas(x2, w1, b1, w2, b2, block_b=384))
    assert jnp.allclose(out2b, ref2, atol=1e-5, rtol=1e-5), "mismatch vs reference (ragged)"

    # --- optional bf16 path (halves HBM traffic on x/w); loose tolerance ---
    out3 = jax.block_until_ready(
        mlp_pallas(x2, w1, b1, w2, b2, compute_dtype=jnp.bfloat16))
    assert out3.dtype == x2.dtype
    assert jnp.allclose(out3, ref2, atol=5e-2, rtol=5e-2), "mismatch vs reference (bf16)"

    print("KERNEL_OK")
</pallas_src>

<mosaic_0001>
module attributes {stable_mosaic.version = 11 : i64} {
  func.func @_mlp_kernel(%arg0: i32, %arg1: memref<8x32xf32, #tpu.memory_space<vmem>>, %arg2: memref<32x3xf32, #tpu.memory_space<vmem>>, %arg3: memref<1x3xf32, #tpu.memory_space<vmem>>, %arg4: memref<3x4xf32, #tpu.memory_space<vmem>>, %arg5: memref<1x4xf32, #tpu.memory_space<vmem>>, %arg6: memref<8x4xf32, #tpu.memory_space<vmem>>) attributes {dimension_semantics = [#tpu.dimension_semantics<parallel>], iteration_bounds = array<i64: 1>, scalar_prefetch = 0 : i64, scratch_operands = 0 : i64, tpu.core_type = #tpu.core_type<tc>, window_params = [{transform_indices = @transform_0, window_bounds = array<i64: 8, 32>}, {pipeline_mode = #tpu.pipeline_mode<synchronous>, transform_indices = @transform_1, window_bounds = array<i64: 32, 3>}, {pipeline_mode = #tpu.pipeline_mode<synchronous>, transform_indices = @transform_2, window_bounds = array<i64: 1, 3>}, {pipeline_mode = #tpu.pipeline_mode<synchronous>, transform_indices = @transform_3, window_bounds = array<i64: 3, 4>}, {pipeline_mode = #tpu.pipeline_mode<synchronous>, transform_indices = @transform_4, window_bounds = array<i64: 1, 4>}, {transform_indices = @transform_5, window_bounds = array<i64: 8, 4>}]} {
    %c0 = arith.constant 0 : index
    %c0_0 = arith.constant 0 : index
    %0 = vector.load %arg1[%c0, %c0_0] : memref<8x32xf32, #tpu.memory_space<vmem>>, vector<8x32xf32>
    %c0_1 = arith.constant 0 : index
    %c0_2 = arith.constant 0 : index
    %1 = vector.load %arg2[%c0_1, %c0_2] : memref<32x3xf32, #tpu.memory_space<vmem>>, vector<32x3xf32>
    %cst = arith.constant dense<0.000000e+00> : vector<8x3xf32>
    %2 = tpu.matmul %0, %1, %cst {dimension_numbers = #tpu.dot_dimension_numbers<[1], [0], [0], [1], [0, 0, 1, 1], [], []>} : vector<8x32xf32>, vector<32x3xf32>, vector<8x3xf32> -> vector<8x3xf32>
    %c0_3 = arith.constant 0 : index
    %c0_4 = arith.constant 0 : index
    %3 = vector.load %arg3[%c0_3, %c0_4] : memref<1x3xf32, #tpu.memory_space<vmem>>, vector<1x3xf32>
    %4 = vector.broadcast %3 : vector<1x3xf32> to vector<8x3xf32>
    %5 = arith.addf %2, %4 : vector<8x3xf32>
    %cst_5 = arith.constant 0.000000e+00 : f32
    %6 = vector.broadcast %cst_5 : f32 to vector<8x3xf32>
    %7 = arith.maximumf %5, %6 : vector<8x3xf32>
    %c0_6 = arith.constant 0 : index
    %c0_7 = arith.constant 0 : index
    %8 = vector.load %arg4[%c0_6, %c0_7] : memref<3x4xf32, #tpu.memory_space<vmem>>, vector<3x4xf32>
    %cst_8 = arith.constant dense<0.000000e+00> : vector<8x4xf32>
    %9 = tpu.matmul %7, %8, %cst_8 {dimension_numbers = #tpu.dot_dimension_numbers<[1], [0], [0], [1], [0, 0, 1, 1], [], []>} : vector<8x3xf32>, vector<3x4xf32>, vector<8x4xf32> -> vector<8x4xf32>
    %c0_9 = arith.constant 0 : index
    %c0_10 = arith.constant 0 : index
    %10 = vector.load %arg5[%c0_9, %c0_10] : memref<1x4xf32, #tpu.memory_space<vmem>>, vector<1x4xf32>
    %11 = vector.broadcast %10 : vector<1x4xf32> to vector<8x4xf32>
    %12 = arith.addf %9, %11 : vector<8x4xf32>
    %c0_11 = arith.constant 0 : index
    %c0_12 = arith.constant 0 : index
    %13 = vector.load %arg6[%c0_11, %c0_12] : memref<8x4xf32, #tpu.memory_space<vmem>>, vector<8x4xf32>
    tpu.vector_store %arg6[%c0_11, %c0_12], %12 {strides = array<i32>} : memref<8x4xf32, #tpu.memory_space<vmem>>, vector<8x4xf32>,
    return
  }
  func.func @transform_0(%arg0: i32) -> (i32, i32) {
    %c0_i32 = arith.constant 0 : i32
    %c0_i32_0 = arith.constant 0 : i32
    return %arg0, %c0_i32 : i32, i32
  }
  func.func @transform_1(%arg0: i32) -> (i32, i32) {
    %c0_i32 = arith.constant 0 : i32
    %c0_i32_0 = arith.constant 0 : i32
    %c0_i32_1 = arith.constant 0 : i32
    return %c0_i32, %c0_i32_0 : i32, i32
  }
  func.func @transform_2(%arg0: i32) -> (i32, i32) {
    %c0_i32 = arith.constant 0 : i32
    %c0_i32_0 = arith.constant 0 : i32
    %c0_i32_1 = arith.constant 0 : i32
    return %c0_i32, %c0_i32_0 : i32, i32
  }
  func.func @transform_3(%arg0: i32) -> (i32, i32) {
    %c0_i32 = arith.constant 0 : i32
    %c0_i32_0 = arith.constant 0 : i32
    %c0_i32_1 = arith.constant 0 : i32
    return %c0_i32, %c0_i32_0 : i32, i32
  }
  func.func @transform_4(%arg0: i32) -> (i32, i32) {
    %c0_i32 = arith.constant 0 : i32
    %c0_i32_0 = arith.constant 0 : i32
    %c0_i32_1 = arith.constant 0 : i32
    return %c0_i32, %c0_i32_0 : i32, i32
  }
  func.func @transform_5(%arg0: i32) -> (i32, i32) {
    %c0_i32 = arith.constant 0 : i32
    %c0_i32_0 = arith.constant 0 : i32
    return %arg0, %c0_i32 : i32, i32
  }
}

</mosaic_0001>

<bundles_post_ra>
// kernel: tpu_custom_call.1
= control target key start
LH: loop header
LB: loop body
LE: loop exit
PB: predicated region body
PF: predicated region fallthrough
CT: control target
= control target key end

     0   :  { %v236_v0 = vmov 0.0|0.0   ;;  %vm237_vm0 = vmmov 0   ;;  %v238_v4 = vmov 0.0   ;;  %vm32_vm1 = vcmask 261120   ;;  %s296_s1 = inlined_call_operand.vmem [shape: f32[32,3], index: 1, kind: input, shape index: {}]   ;;  %s297_s0 = inlined_call_operand.vmem [shape: f32[8,32], index: 0, kind: input, shape index: {}]   ;;  %s298_s3 = inlined_call_operand.vmem [shape: f32[3,4], index: 3, kind: input, shape index: {}]   ;;  %s299_s2 = inlined_call_operand.vmem [shape: f32[1,3], index: 2, kind: input, shape index: {}]   ;;  %s300_s4 = inlined_call_operand.vmem [shape: f32[1,4], index: 4, kind: input, shape index: {}]   ;;  %s301_s5 = inlined_call_operand.vmem [shape: f32[8,4], index: 5, kind: output, shape index: {}]  }
   0x1   :  { %227 = vmatprep.subr.bf16.mxu0 %v236_v0  ;;  %v21_v1 = vld [vmem:[%s296_s1] sm:$0xff]  ;;  %v22_v2 = vld [vmem:[%s296_s1 + $0x8] sm:$0xff]  ;;  %v23_v3 = vld [vmem:[%s296_s1 + $0x10] sm:$0xff]  ;;  %219 = vmatprep.mubr.msk.f32.mxu0 %vm237_vm0, %v238_v4  ;;  %vm119_vm2 = vcmask 1042432   ;;  %vm115_vm3 = vcmask 23552   ;;  %vm193_vm4 = vcmask 31744  }
   0x2   :  { %v228_v5 = vpack.c.bf16 %v22_v2, %v21_v1  ;;  %v24_v6 = vld [vmem:[%s296_s1 + $0x18] sm:$0xff]  ;;  %222 = vmatprep.subr.mxu1 %v238_v4  ;;  %224 = vmatprep.mubr.msk.f32.mxu1 %vm237_vm0, %v238_v4  ;;  %v20_v8 = vld [vmem:[%s297_s0] sm:$0xff] }
   0x3   :  { %v231_v7 = vpack.c.bf16 %v24_v6, %v23_v3  ;;  %v107_v9 = vld [vmem:[%s298_s3] sm:$0x7] }
   0x4   :  { %229 = vmatpush3.bf16.msra.mxu0 %v228_v5  ;;  %223 = vmatpush3.msk.msra.mxu1 %vm119_vm2, %v107_v9  ;;  %v199_v10 = vld [vmem:[%s299_s2] ss:$0 sm:$0xff] }
   0x5   :  { %230 = vmatprep.subr.bf16.mxu0 %v236_v0  ;;  %v201_v15 = vld [vmem:[%s300_s4] ss:$0 sm:$0xff] }
   0x8   :  { %232 = vmatpush3.bf16.msra.mxu0 %v231_v7 }
   0xb   :  { %220 = vmatmul.mubr.msk.f32.vlgmr.msra.gmra.mrb[0].mxu0 %vm32_vm1, %v20_v8 }
  0xde   :  { %v102_v11 = vpop.f32.mrb[0].mxu0 }
  0xdf   :  { %v103_v12 = vadd.f32 %v199_v10, %v102_v11  ;;  %v221_v13 = vpop.f32.mrb[1].mxu0 }
  0xe1   :  { %v106_v14 = vmax.f32 %v103_v12, 0.0 }
  0xe3   :  { %225 = vmatmul.mubr.msk.f32.vlgmr.msra.gmra.mrb[0].mxu1 %vm115_vm3, %v106_v14 }
 0x1b6   :  { %v189_v16 = vpop.f32.mrb[0].mxu1 }
 0x1b7   :  { %v190_v17 = vadd.f32 %v201_v15, %v189_v16  ;;  %v226_v18 = vpop.f32.mrb[1].mxu1 }
 0x1b9   :  { %194 = vst.msk [vmem:[%s301_s5] sm:$0xff] %vm193_vm4, %v190_v17 }

</bundles_post_ra>
